<compile_context>
chip_gen: v6e
topology: v6e:2x2x1
jax: 0.10.0
libtpu: 0.0.40
codegen_flags: <defaults>
</compile_context>

<pallas_src>
import functools

import jax
import jax.numpy as jnp
from jax.experimental import pallas as pl
from jax.experimental.pallas import tpu as pltpu


_CHUNK_UNROLL_LIMIT = 32  # max fully-unrolled 128-lane chunks per grid step


def _mae_rowsum_kernel(x_ref, y_ref, out_ref, acc_ref):
    """Accumulate per-row sums of |x - y| for one (tm, tc) block.

    acc_ref: (tm, lw) f32 VMEM scratch of lane-partials. Every column tile only
    does VPU sub/abs/add into it; the cross-lane reduce and the lane-width-1
    store to out_ref happen once per row tile (last column tile).
    """
    j = pl.program_id(1)
    tc = x_ref.shape[-1]
    lw = acc_ref.shape[-1]
    n_chunks = tc // lw

    @pl.when(j == 0)
    def _init():
        acc_ref[...] = jnp.zeros_like(acc_ref)

    def accum(start):
        xs = x_ref[:, pl.ds(start, lw)].astype(jnp.float32)
        ys = y_ref[:, pl.ds(start, lw)].astype(jnp.float32)
        acc_ref[...] += jnp.abs(xs - ys)

    if n_chunks <= _CHUNK_UNROLL_LIMIT:
        for k in range(n_chunks):
            accum(k * lw)
    else:
        @pl.loop(0, n_chunks)
        def _(k):
            accum(pl.multiple_of(k * lw, lw))

    @pl.when(j == pl.num_programs(1) - 1)
    def _finalize():
        out_ref[...] = jnp.sum(acc_ref[...], axis=-1, keepdims=True)


def _divisors_desc(n):
    return [d for d in range(n, 0, -1) if n % d == 0]


def _sublane_multiple(dtype):
    # f32 -> 8, bf16/f16 -> 16, int8/fp8 -> 32 (full vreg density).
    return {4: 8, 2: 16, 1: 32}.get(jnp.dtype(dtype).itemsize, 8)


def _pick_tiles(n_rows, n_cols, elem_bytes, target_bytes, sublane):
    """Pick (tm, tc) dividing (n_rows, n_cols), respecting (sublane, 128)
    layout rules (or full extent), with tm*tc*elem_bytes <= target_bytes."""
    col_cands = [d for d in _divisors_desc(n_cols) if d % 128 == 0] or [n_cols]
    row_cands = [d for d in _divisors_desc(n_rows) if d % sublane == 0] or [n_rows]
    best = None
    for tc in col_cands:
        for tm in row_cands:
            size = tm * tc * elem_bytes
            if size <= target_bytes:
                if (best is None or size > best[2]
                        or (size == best[2] and tm > best[0])):
                    best = (tm, tc, size)
                break  # row_cands descending -> first fit is largest for this tc
    if best is None:
        # TODO(synk): cdiv grid + in-kernel tail mask for shapes with no
        # (sublane,128)-aligned divisors; for now fall back to the smallest
        # legal block (may exceed target_bytes for awkward shapes).
        best = (row_cands[-1], col_cands[-1], 0)
    tm, tc = best[0], best[1]
    # Keep >= 2 row tiles when possible so the "parallel" axis can be split
    # across the 2 TensorCores of a v7x megacore.
    if n_rows // tm < 2:
        for cand in row_cands:
            if cand < tm and n_rows // cand >= 2:
                tm = cand
                break
    return tm, tc


def _default_block_bytes():
    """Per-generation input-block budget (~VMEM/12, clamped to [2, 8] MiB)."""
    try:
        vmem = int(pltpu.get_tpu_info().vmem_capacity_bytes)
        return int(min(8 << 20, max(2 << 20, vmem // 12)))
    except Exception:
        return 4 << 20


@functools.partial(jax.jit, static_argnames=("target_block_bytes",))
def _mae_loss_impl(x, y, mean, std, *, target_block_bytes):
    del mean  # (x*std+mean) - (y*std+mean) == std*(x-y): mean cancels exactly.
    B, C, T, V = x.shape
    assert y.shape == x.shape

    std_arr = jnp.asarray(std, jnp.float32)
    if std_arr.ndim > 1 or (std_arr.ndim == 1 and std_arr.shape[0] not in (1, C)):
        raise ValueError(
            "mae_loss expects std to be a scalar or per-channel [C] vector; "
            f"got shape {std_arr.shape}")

    M, TV = B * C, T * V
    xf = x.reshape(M, TV)   # zero-cost native-layout view: row r = b*C + c
    yf = y.reshape(M, TV)

    elem_bytes = max(jnp.dtype(x.dtype).itemsize, jnp.dtype(y.dtype).itemsize)
    sublane = max(_sublane_multiple(x.dtype), _sublane_multiple(y.dtype))
    tm, tc = _pick_tiles(M, TV, elem_bytes, target_block_bytes, sublane)
    lw = 128 if tc % 128 == 0 else tc
    grid = (M // tm, TV // tc)

    # VMEM budget: 2 inputs x 2 pipeline buffers x block + f32 lane-partial
    # scratch + (small) output blocks, with 1.5x headroom for temporaries.
    block_bytes = tm * tc * elem_bytes
    vmem_usage = 2 * 2 * block_bytes + tm * lw * 4 + 2 * tm * 4
    vmem_limit = max(32 << 20, int(vmem_usage * 1.5) + (2 << 20))

    cost = pl.CostEstimate(
        flops=3 * M * TV,                       # sub + abs + add per element
        transcendentals=0,
        bytes_accessed=2 * M * TV * elem_bytes + M * 4,
    )

    row_sums = pl.pallas_call(
        _mae_rowsum_kernel,
        out_shape=jax.ShapeDtypeStruct((M, 1), jnp.float32),
        grid_spec=pltpu.PrefetchScalarGridSpec(
            num_scalar_prefetch=0,
            grid=grid,
            in_specs=[
                pl.BlockSpec((tm, tc), lambda i, j: (i, j)),
                pl.BlockSpec((tm, tc), lambda i, j: (i, j)),
            ],
            out_specs=pl.BlockSpec((tm, 1), lambda i, j: (i, 0)),
            scratch_shapes=[pltpu.VMEM((tm, lw), jnp.float32)],
        ),
        compiler_params=pltpu.CompilerParams(
            dimension_semantics=("parallel", "arbitrary"),
            vmem_limit_bytes=vmem_limit,
        ),
        cost_estimate=cost,
    )(xf, yf)

    # O(B*C) epilogue: scale per-row partials by |std_c|, sum, divide by N.
    std_c = jnp.abs(jnp.broadcast_to(std_arr, (C,)))
    row_scale = jnp.tile(std_c, B)              # row r = b*C + c -> |std[c]|
    total = jnp.sum(row_sums[:, 0] * row_scale)
    return total / jnp.float32(M * TV)


def mae_loss(x, y, mean, std, *, target_block_bytes=None):
    """Pallas implementation of MAELoss.forward.

    x, y : [batch, channel, n_time, n_vertex]; mean/std scalar or [channel].
    Returns the scalar f32 mean absolute error after denormalization.
    """
    if target_block_bytes is None:
        target_block_bytes = _default_block_bytes()
    return _mae_loss_impl(x, y, mean, std,
                          target_block_bytes=int(target_block_bytes))


def mae_loss_ref(x, y, mean, std):
    """Pure-JAX reference mirroring the PyTorch module exactly."""
    xp = jnp.transpose(x, (0, 2, 3, 1)).astype(jnp.float32)
    yp = jnp.transpose(y, (0, 2, 3, 1)).astype(jnp.float32)
    xp = xp * std + mean
    yp = yp * std + mean
    return jnp.mean(jnp.abs(xp - yp))


if __name__ == "__main__":
    key = jax.random.PRNGKey(0)

    # --- Case 1: nominal small shape [batch, channel, n_time, n_vertex] ----
    B, C, T, V = 2, 4, 8, 16
    kx, ky, key = jax.random.split(key, 3)
    x = jax.random.normal(kx, (B, C, T, V), dtype=jnp.float32)
    y = jax.random.normal(ky, (B, C, T, V), dtype=jnp.float32)
    mean = jnp.arange(C, dtype=jnp.float32) * 0.5 + 1.0   # per-channel [C]
    std = jnp.arange(C, dtype=jnp.float32) * 0.25 + 2.0   # per-channel [C]

    out = jax.block_until_ready(mae_loss(x, y, mean, std))
    ref = mae_loss_ref(x, y, mean, std)
    assert jnp.allclose(out, ref, rtol=1e-5, atol=1e-5), (out, ref)

    # --- Case 2: larger shape, tiny block budget -> multi-tile grid
    #             (parallel row axis + column reduction + chunk loop) --------
    B2, C2, T2, V2 = 8, 4, 32, 128
    kx2, ky2, key = jax.random.split(key, 3)
    x2 = jax.random.normal(kx2, (B2, C2, T2, V2), dtype=jnp.float32)
    y2 = jax.random.normal(ky2, (B2, C2, T2, V2), dtype=jnp.float32)
    mean2 = jnp.arange(C2, dtype=jnp.float32) * 0.3 - 0.5
    std2 = jnp.arange(C2, dtype=jnp.float32) * 0.1 + 1.5

    out2 = jax.block_until_ready(
        mae_loss(x2, y2, mean2, std2, target_block_bytes=32 * 1024))
    ref2 = mae_loss_ref(x2, y2, mean2, std2)
    assert jnp.allclose(out2, ref2, rtol=1e-5, atol=1e-5), (out2, ref2)

    # --- Case 3: bf16 inputs, scalar mean/std (dtype-aware sublane tiling) --
    B3, C3, T3, V3 = 4, 4, 16, 128
    kx3, ky3, key = jax.random.split(key, 3)
    x3 = jax.random.normal(kx3, (B3, C3, T3, V3), dtype=jnp.float32).astype(jnp.bfloat16)
    y3 = jax.random.normal(ky3, (B3, C3, T3, V3), dtype=jnp.float32).astype(jnp.bfloat16)

    out3 = jax.block_until_ready(mae_loss(x3, y3, 0.5, 2.5))
    ref3 = mae_loss_ref(x3, y3, 0.5, 2.5)
    assert jnp.allclose(out3, ref3, rtol=1e-4, atol=1e-4), (out3, ref3)

    print("KERNEL_OK")
</pallas_src>

<mosaic_0001>
module attributes {stable_mosaic.version = 11 : i64} {
  func.func @_mae_rowsum_kernel(%arg0: i32, %arg1: i32, %arg2: memref<8x128xf32, #tpu.memory_space<vmem>>, %arg3: memref<8x128xf32, #tpu.memory_space<vmem>>, %arg4: memref<8x1xf32, #tpu.memory_space<vmem>>, %arg5: memref<8x128xf32, #tpu.memory_space<vmem>>) attributes {dimension_semantics = [#tpu.dimension_semantics<parallel>, #tpu.dimension_semantics<arbitrary>], iteration_bounds = array<i64: 1, 1>, scalar_prefetch = 0 : i64, scratch_operands = 1 : i64, tpu.core_type = #tpu.core_type<tc>, window_params = [{transform_indices = @transform_0, window_bounds = array<i64: 8, 128>}, {transform_indices = @transform_1, window_bounds = array<i64: 8, 128>}, {transform_indices = @transform_2, window_bounds = array<i64: 8, 1>}]} {
    %c0_i32 = arith.constant 0 : i32
    %0 = arith.cmpi eq, %arg1, %c0_i32 : i32
    %1 = arith.extui %0 : i1 to i32
    %c0_i32_0 = arith.constant 0 : i32
    %2 = arith.cmpi ne, %1, %c0_i32_0 : i32
    scf.if %2 {
      %cst = arith.constant 0.000000e+00 : f32
      %13 = vector.broadcast %cst : f32 to vector<8x128xf32>
      %c0_10 = arith.constant 0 : index
      %c0_11 = arith.constant 0 : index
      %14 = vector.load %arg5[%c0_10, %c0_11] : memref<8x128xf32, #tpu.memory_space<vmem>>, vector<8x128xf32>
      tpu.vector_store %arg5[%c0_10, %c0_11], %13 {strides = array<i32>} : memref<8x128xf32, #tpu.memory_space<vmem>>, vector<8x128xf32>,
    } else {
    }
    %c0 = arith.constant 0 : index
    %c0_1 = arith.constant 0 : index
    %3 = vector.load %arg2[%c0, %c0_1] : memref<8x128xf32, #tpu.memory_space<vmem>>, vector<8x128xf32>
    %c0_2 = arith.constant 0 : index
    %c0_3 = arith.constant 0 : index
    %4 = vector.load %arg3[%c0_2, %c0_3] : memref<8x128xf32, #tpu.memory_space<vmem>>, vector<8x128xf32>
    %c0_4 = arith.constant 0 : index
    %c0_5 = arith.constant 0 : index
    %5 = vector.load %arg5[%c0_4, %c0_5] : memref<8x128xf32, #tpu.memory_space<vmem>>, vector<8x128xf32>
    %6 = arith.subf %3, %4 : vector<8x128xf32>
    %7 = math.absf %6 : vector<8x128xf32>
    %8 = arith.addf %5, %7 : vector<8x128xf32>
    %c0_6 = arith.constant 0 : index
    %c0_7 = arith.constant 0 : index
    %9 = vector.load %arg5[%c0_6, %c0_7] : memref<8x128xf32, #tpu.memory_space<vmem>>, vector<8x128xf32>
    tpu.vector_store %arg5[%c0_6, %c0_7], %8 {strides = array<i32>} : memref<8x128xf32, #tpu.memory_space<vmem>>, vector<8x128xf32>,
    %c0_i32_8 = arith.constant 0 : i32
    %10 = arith.cmpi eq, %arg1, %c0_i32_8 : i32
    %11 = arith.extui %10 : i1 to i32
    %c0_i32_9 = arith.constant 0 : i32
    %12 = arith.cmpi ne, %11, %c0_i32_9 : i32
    scf.if %12 {
      %c0_10 = arith.constant 0 : index
      %c0_11 = arith.constant 0 : index
      %13 = vector.load %arg5[%c0_10, %c0_11] : memref<8x128xf32, #tpu.memory_space<vmem>>, vector<8x128xf32>
      %cst = arith.constant dense<0.000000e+00> : vector<8xf32>
      %14 = vector.multi_reduction <add>, %13, %cst [1] : vector<8x128xf32> to vector<8xf32>
      %15 = vector.shape_cast %14 : vector<8xf32> to vector<8x1xf32>
      %c0_12 = arith.constant 0 : index
      %c0_13 = arith.constant 0 : index
      %16 = vector.load %arg4[%c0_12, %c0_13] : memref<8x1xf32, #tpu.memory_space<vmem>>, vector<8x1xf32>
      tpu.vector_store %arg4[%c0_12, %c0_13], %15 {strides = array<i32>} : memref<8x1xf32, #tpu.memory_space<vmem>>, vector<8x1xf32>,
    } else {
    }
    return
  }
  func.func @transform_0(%arg0: i32, %arg1: i32) -> (i32, i32) {
    %c0_i32 = arith.constant 0 : i32
    return %arg0, %arg1 : i32, i32
  }
  func.func @transform_1(%arg0: i32, %arg1: i32) -> (i32, i32) {
    %c0_i32 = arith.constant 0 : i32
    return %arg0, %arg1 : i32, i32
  }
  func.func @transform_2(%arg0: i32, %arg1: i32) -> (i32, i32) {
    %c0_i32 = arith.constant 0 : i32
    %c0_i32_0 = arith.constant 0 : i32
    return %arg0, %c0_i32 : i32, i32
  }
}

</mosaic_0001>

<bundles_post_ra>
// kernel: tile.8
= control target key start
LH: loop header
LB: loop body
LE: loop exit
PB: predicated region body
PF: predicated region fallthrough
CT: control target
= control target key end

     0   :  { %s22_s0 = inlined_call_operand.vmem [shape: f32[4], index: 0, kind: input, shape index: {}]   ;;  %s23_s1 = inlined_call_operand.vmem [shape: f32[2,4], index: 1, kind: output, shape index: {}]  }
   0x1   :  { %v4_v0 = vld [vmem:[%s22_s0] ss:$0 sm:$0xff] }
   0x2   :  { %5 = vst [vmem:[%s23_s1] sm:$0x3] %v4_v0 }

// kernel: tile.9
= control target key start
LH: loop header
LB: loop body
LE: loop exit
PB: predicated region body
PF: predicated region fallthrough
CT: control target
= control target key end

     0   :  { %vm8_vm0 = vcmask 31744   ;;  %vm14_vm1 = vcmask 64544   ;;  %s42_s0 = inlined_call_operand.vmem [shape: f32[2,4], index: 0, kind: input, shape index: {}]   ;;  %s43_s1 = inlined_call_operand.vmem [shape: f32[8], index: 1, kind: output, shape index: {}]  }
   0x1   :  { %v5_v0 = vld [vmem:[%s42_s0] sm:$0x3]  ;;  %s25_s0 = smov 4  }
   0x2   :  { %6 = vst [vmem:[#allocation1] sm:$0x3] %v5_v0 }
   0x9   :  { %v11_v1 = vld [vmem:[#allocation1 + $0x1] sm:$0x1]   ;;  %v7_v2 = vld [vmem:[#allocation1] sm:$0x1]  }
   0xa   :  { %12 = vrot.lane.b32.xlu0 %v11_v1, %s25_s0  ;;  %9 = vst.msk [vmem:[#allocation0] sm:$0x1] %vm8_vm0, %v7_v2  }
  0x7c   :  { %v13_v3 = vpop.permute.xlu0 %12  }
  0x7d   :  { %15 = vst.msk [vmem:[#allocation0] sm:$0x1] %vm14_vm1, %v13_v3  }
  0x84   :  { %v20_v4 = vld [vmem:[#allocation0] sm:$0x1] }
  0x85   :  { %23 = vst [vmem:[%s43_s1] sm:$0x1] %v20_v4 }

// kernel: _mae_loss_impl.1
= control target key start
LH: loop header
LB: loop body
LE: loop exit
PB: predicated region body
PF: predicated region fallthrough
CT: control target
= control target key end

     0   :  { %vm29_vm0 = vcmask 7168   ;;  %s59_s0 = inlined_call_operand.vmem [shape: f32[8,128], index: 0, kind: input, shape index: {}]   ;;  %s60_s1 = inlined_call_operand.vmem [shape: f32[8,128], index: 1, kind: input, shape index: {}]   ;;  %s61_s2 = inlined_call_operand.vmem [shape: f32[8,1], index: 2, kind: output, shape index: {}]  }
   0x1   :  { %v16_v0 = vld [vmem:[%s59_s0] sm:$0xff] }
   0x2   :  { %v17_v1 = vld [vmem:[%s60_s1] sm:$0xff] }
   0x3   :  { %v19_v2 = vsub.f32 %v16_v0, %v17_v1 }
   0x5   :  { %v20_v3 = vand.u32 2147483647, %v19_v2 }
   0x7   :  { %27 = vadd.xlane.f32.xlu0 %v20_v3 }
  0x90   :  { %v28_v4 = vpop.xlane.xlu0 %27 }
  0x91   :  { %30 = vst.msk [vmem:[%s61_s2] sm:$0xff] %vm29_vm0, %v28_v4 }

</bundles_post_ra>
